<compile_context>
chip_gen: v7x
topology: tpu7x:2x2x1
jax: 0.10.0
libtpu: 0.0.40
codegen_flags: <defaults>
</compile_context>

<pallas_src>
import functools

import jax
import jax.numpy as jnp
from jax.experimental import pallas as pl
from jax.experimental.pallas import tpu as pltpu

_LANE = 128
_SUBLANE = 8


def _layernorm_kernel(x_ref, a_ref, b_ref, o_ref, *, eps, features, masked):
    """One (TM, Fp) row-tile of LayerNorm (unbiased std, eps added to std)."""
    x = x_ref[...].astype(jnp.float32)
    fp = x.shape[-1]

    if masked:
        # Feature axis is zero-padded to a lane-dense multiple of 128.  sum(x)
        # is unaffected by the zero pad, but (x - mean) is not, so mask the
        # squared-difference reduction to the first `features` lanes.
        lane = jax.lax.broadcasted_iota(jnp.int32, (1, fp), 1)
        valid = lane < features
        mean = jnp.sum(x, axis=-1, keepdims=True) / jnp.float32(features)
        diff = x - mean
        sq = jnp.where(valid, diff * diff, jnp.float32(0.0))
    else:
        mean = jnp.mean(x, axis=-1, keepdims=True)
        diff = x - mean
        sq = diff * diff

    # Unbiased variance (torch.Tensor.std default: correction = 1).
    # features == 1 yields inf/nan, same as torch.
    var = jnp.sum(sq, axis=-1, keepdims=True) / jnp.float32(features - 1)
    std = jnp.sqrt(var)

    # (TM, 1) reciprocal + multiply instead of a full-width (TM, Fp) divide;
    # exact (approx=False) to hold the 1e-5 tolerance vs. the reference.
    inv = pl.reciprocal(std + jnp.float32(eps), approx=False)

    # a_ref / b_ref are already f32 (pre-cast in the wrapper, VMEM-resident).
    o_ref[...] = (diff * inv * a_ref[...] + b_ref[...]).astype(o_ref.dtype)


def _vmem_limit_bytes():
    """Scoped-VMEM limit to request: ~75% of physical, clamped to [32, 96] MiB."""
    try:
        phys = int(pltpu.get_tpu_info().vmem_capacity_bytes)
    except Exception:
        phys = 64 << 20  # conservative (v7x: 64 MiB per TensorCore)
    return max(32 << 20, min(96 << 20, int(phys * 0.75)))


def _divisors(n):
    out = set()
    i = 1
    while i * i <= n:
        if n % i == 0:
            out.add(i)
            out.add(n // i)
        i += 1
    return sorted(out)


def _choose_block_rows(rows_p, features_p, x_itemsize, vmem_limit,
                       block_rows=None):
    """Largest sublane-aligned divisor of rows_p that fits the VMEM pipeline."""
    # Per-row pipeline footprint:
    #   double-buffered input + output tiles in x's dtype: 2 * 2 * Fp * itemsize
    #   ~2 live (TM, Fp) f32 temporaries inside the kernel (x/diff; out reuses)
    per_row = 4 * features_p * x_itemsize + 2 * features_p * 4
    budget = int(vmem_limit * 0.8)  # headroom for a/b blocks + compiler scratch
    cap = budget // max(per_row, 1)
    cap = min(cap, rows_p)
    # Keep >= ~4 grid steps (2 per TensorCore on v7x) when the problem is big
    # enough for the 2-deep pipeline / both cores to have work; otherwise take
    # the biggest tile that fits VMEM.
    if rows_p >= 4 * _SUBLANE:
        cap = min(cap, max(_SUBLANE, (rows_p // 4 // _SUBLANE) * _SUBLANE))
    cap = max(_SUBLANE, (cap // _SUBLANE) * _SUBLANE)

    if block_rows is not None:
        # Honor the manual knob, rounded to a sublane-aligned size.
        cap = min(cap, max(_SUBLANE, (int(block_rows) // _SUBLANE) * _SUBLANE))

    # tm must divide rows_p and be a multiple of 8:  tm = 8*d with d | rows_p/8.
    cands = [_SUBLANE * d for d in _divisors(rows_p // _SUBLANE)
             if _SUBLANE * d <= cap]
    tm = max(cands) if cands else _SUBLANE

    # Prefer an even grid length when the grid is short: v7x's 2 TensorCores
    # share the "parallel" axis, and an odd short grid idles one core on the
    # tail step.  (Skipped when the user pinned block_rows.)
    steps = rows_p // tm
    if (block_rows is None and steps % 2 == 1 and steps < 16
            and tm % (2 * _SUBLANE) == 0):
        tm //= 2
    return tm


def layer_norm(x, a_2, b_2, eps=1e-6, block_rows=None):
    """LayerNorm over the last axis of x (any leading dims)."""
    orig_shape = x.shape
    features = int(orig_shape[-1])
    rows = 1
    for d in orig_shape[:-1]:
        rows *= int(d)
    rows = max(rows, 1)

    # Lane-dense feature axis (multiple of 128) -> unmasked vector stores;
    # sublane-aligned row count (multiple of 8) -> unmasked, aligned tiles.
    features_p = -(-features // _LANE) * _LANE
    rows_p = -(-rows // _SUBLANE) * _SUBLANE
    masked = features_p != features

    x2 = x.reshape(rows, features)
    # Pre-cast scale/shift to the compute dtype so the kernel body does no
    # per-step cast; constant index_map keeps them VMEM-resident.
    a2 = a_2.reshape(1, features).astype(jnp.float32)
    b2 = b_2.reshape(1, features).astype(jnp.float32)

    if masked:
        x2 = jnp.pad(x2, ((0, 0), (0, features_p - features)))
        a2 = jnp.pad(a2, ((0, 0), (0, features_p - features)))
        b2 = jnp.pad(b2, ((0, 0), (0, features_p - features)))
    if rows_p != rows:
        x2 = jnp.pad(x2, ((0, rows_p - rows), (0, 0)))

    vmem_limit = _vmem_limit_bytes()
    tm = _choose_block_rows(rows_p, features_p, x2.dtype.itemsize, vmem_limit,
                            block_rows=block_rows)
    grid = (rows_p // tm,)

    out = pl.pallas_call(
        functools.partial(_layernorm_kernel, eps=eps, features=features,
                          masked=masked),
        out_shape=jax.ShapeDtypeStruct((rows_p, features_p), x.dtype),
        grid_spec=pltpu.PrefetchScalarGridSpec(
            num_scalar_prefetch=0,
            grid=grid,
            in_specs=[
                pl.BlockSpec((tm, features_p), lambda i: (i, 0)),
                pl.BlockSpec((1, features_p), lambda i: (0, 0)),
                pl.BlockSpec((1, features_p), lambda i: (0, 0)),
            ],
            out_specs=pl.BlockSpec((tm, features_p), lambda i: (i, 0)),
        ),
        compiler_params=pltpu.CompilerParams(
            dimension_semantics=("parallel",),
            vmem_limit_bytes=vmem_limit,
        ),
    )(x2, a2, b2)

    if masked or rows_p != rows:
        out = out[:rows, :features]
    return out.reshape(orig_shape)


if __name__ == "__main__":
    # Deterministic parameters: module init is ones/zeros.
    batch, seq, hidden = 2, 8, 32
    a_2 = jnp.ones((hidden,), dtype=jnp.float32)
    b_2 = jnp.zeros((hidden,), dtype=jnp.float32)

    key = jax.random.PRNGKey(0)
    x = jax.random.normal(key, (batch, seq, hidden), dtype=jnp.float32)

    y = layer_norm(x, a_2, b_2, eps=1e-6)
    jax.block_until_ready(y)

    # Reference in plain JAX (unbiased std, eps added to std — exactly the
    # PyTorch module's forward).
    mean = jnp.mean(x, axis=-1, keepdims=True)
    std = jnp.std(x, axis=-1, keepdims=True, ddof=1)
    y_ref = a_2 * (x - mean) / (std + 1e-6) + b_2
    assert jnp.allclose(y, y_ref, atol=1e-5, rtol=1e-5), "mismatch vs reference"

    print("KERNEL_OK")
</pallas_src>

<mosaic_0001>
module attributes {stable_mosaic.version = 11 : i64} {
  func.func @_layernorm_kernel(%arg0: i32, %arg1: memref<8x128xf32, #tpu.memory_space<vmem>>, %arg2: memref<1x128xf32, #tpu.memory_space<vmem>>, %arg3: memref<1x128xf32, #tpu.memory_space<vmem>>, %arg4: memref<8x128xf32, #tpu.memory_space<vmem>>) attributes {dimension_semantics = [#tpu.dimension_semantics<parallel>], iteration_bounds = array<i64: 2>, scalar_prefetch = 0 : i64, scratch_operands = 0 : i64, tpu.core_type = #tpu.core_type<tc>, window_params = [{transform_indices = @transform_0, window_bounds = array<i64: 8, 128>}, {pipeline_mode = #tpu.pipeline_mode<synchronous>, transform_indices = @transform_1, window_bounds = array<i64: 1, 128>}, {pipeline_mode = #tpu.pipeline_mode<synchronous>, transform_indices = @transform_2, window_bounds = array<i64: 1, 128>}, {transform_indices = @transform_3, window_bounds = array<i64: 8, 128>}]} {
    %c0 = arith.constant 0 : index
    %c0_0 = arith.constant 0 : index
    %0 = vector.load %arg1[%c0, %c0_0] : memref<8x128xf32, #tpu.memory_space<vmem>>, vector<8x128xf32>
    %1 = tpu.iota {dimensions = array<i32: 1>} : vector<1x128xi32>
    %c32_i32 = arith.constant 32 : i32
    %2 = vector.broadcast %c32_i32 : i32 to vector<1x128xi32>
    %3 = arith.cmpi slt, %1, %2 : vector<1x128xi32>
    %cst = arith.constant dense<0.000000e+00> : vector<8xf32>
    %4 = vector.multi_reduction <add>, %0, %cst [1] : vector<8x128xf32> to vector<8xf32>
    %5 = vector.shape_cast %4 : vector<8xf32> to vector<8x1xf32>
    %cst_1 = arith.constant 3.200000e+01 : f32
    %6 = vector.broadcast %cst_1 : f32 to vector<8x1xf32>
    %7 = arith.divf %5, %6 : vector<8x1xf32>
    %8 = vector.broadcast %7 : vector<8x1xf32> to vector<8x128xf32>
    %9 = arith.subf %0, %8 : vector<8x128xf32>
    %10 = arith.mulf %9, %9 : vector<8x128xf32>
    %cst_2 = arith.constant 0.000000e+00 : f32
    %11 = vector.shape_cast %3 : vector<1x128xi1> to vector<1x128xi1>
    %12 = vector.broadcast %11 : vector<1x128xi1> to vector<8x128xi1>
    %13 = vector.broadcast %cst_2 : f32 to vector<8x128xf32>
    %14 = arith.select %12, %10, %13 : vector<8x128xi1>, vector<8x128xf32>
    %cst_3 = arith.constant dense<0.000000e+00> : vector<8xf32>
    %15 = vector.multi_reduction <add>, %14, %cst_3 [1] : vector<8x128xf32> to vector<8xf32>
    %16 = vector.shape_cast %15 : vector<8xf32> to vector<8x1xf32>
    %cst_4 = arith.constant 3.100000e+01 : f32
    %17 = vector.broadcast %cst_4 : f32 to vector<8x1xf32>
    %18 = arith.divf %16, %17 : vector<8x1xf32>
    %19 = math.sqrt %18 : vector<8x1xf32>
    %cst_5 = arith.constant 9.99999997E-7 : f32
    %20 = vector.broadcast %cst_5 : f32 to vector<8x1xf32>
    %21 = arith.addf %19, %20 : vector<8x1xf32>
    %22 = tpu.reciprocal %21 : vector<8x1xf32> -> vector<8x1xf32>
    %23 = vector.broadcast %22 : vector<8x1xf32> to vector<8x128xf32>
    %24 = arith.mulf %9, %23 : vector<8x128xf32>
    %c0_6 = arith.constant 0 : index
    %c0_7 = arith.constant 0 : index
    %25 = vector.load %arg2[%c0_6, %c0_7] : memref<1x128xf32, #tpu.memory_space<vmem>>, vector<1x128xf32>
    %26 = vector.broadcast %25 : vector<1x128xf32> to vector<8x128xf32>
    %27 = arith.mulf %24, %26 : vector<8x128xf32>
    %c0_8 = arith.constant 0 : index
    %c0_9 = arith.constant 0 : index
    %28 = vector.load %arg3[%c0_8, %c0_9] : memref<1x128xf32, #tpu.memory_space<vmem>>, vector<1x128xf32>
    %29 = vector.broadcast %28 : vector<1x128xf32> to vector<8x128xf32>
    %30 = arith.addf %27, %29 : vector<8x128xf32>
    %c0_10 = arith.constant 0 : index
    %c0_11 = arith.constant 0 : index
    %31 = vector.load %arg4[%c0_10, %c0_11] : memref<8x128xf32, #tpu.memory_space<vmem>>, vector<8x128xf32>
    tpu.vector_store %arg4[%c0_10, %c0_11], %30 {strides = array<i32>} : memref<8x128xf32, #tpu.memory_space<vmem>>, vector<8x128xf32>,
    return
  }
  func.func @transform_0(%arg0: i32) -> (i32, i32) {
    %c0_i32 = arith.constant 0 : i32
    %c0_i32_0 = arith.constant 0 : i32
    return %arg0, %c0_i32 : i32, i32
  }
  func.func @transform_1(%arg0: i32) -> (i32, i32) {
    %c0_i32 = arith.constant 0 : i32
    %c0_i32_0 = arith.constant 0 : i32
    %c0_i32_1 = arith.constant 0 : i32
    return %c0_i32, %c0_i32_0 : i32, i32
  }
  func.func @transform_2(%arg0: i32) -> (i32, i32) {
    %c0_i32 = arith.constant 0 : i32
    %c0_i32_0 = arith.constant 0 : i32
    %c0_i32_1 = arith.constant 0 : i32
    return %c0_i32, %c0_i32_0 : i32, i32
  }
  func.func @transform_3(%arg0: i32) -> (i32, i32) {
    %c0_i32 = arith.constant 0 : i32
    %c0_i32_0 = arith.constant 0 : i32
    return %arg0, %c0_i32 : i32, i32
  }
}

</mosaic_0001>

<bundles_post_ra>
// kernel: tpu_custom_call.1
= control target key start
LH: loop header
LB: loop body
LE: loop exit
PB: predicated region body
PF: predicated region fallthrough
CT: control target
= control target key end

     0   :  { %8 = vsyncpa [#allocation3], 0  ;;  %s669_s0 = inlined_call_operand.hbm [shape: f32[16,128], index: 0, kind: input, shape index: {}]   ;;  %s670_s1 = inlined_call_operand.vmem [shape: f32[1,128], index: 1, kind: input, shape index: {}]   ;;  %s671_s2 = inlined_call_operand.vmem [shape: f32[1,128], index: 2, kind: input, shape index: {}]   ;;  %s672_s3 = inlined_call_operand.hbm [shape: f32[16,128], index: 3, kind: output, shape index: {}]  }
   0x1   :  { %10 = vsyncpa [#allocation3 + $0x1], 0 }
   0x2   :  { %11 = vsyncpa [#allocation4], 0 }
   0x3   :  { %13 = vsyncpa [#allocation4 + $0x1], 0  ;;  %s498_s12 = smov 0   ;;  %s500_s13 = smov 0  }
   0x4   :  { %s502_s14 = smov 0   ;;  %s504_s15 = smov 0  }
   0x5 LB: > { %s519_s16 = sadd.s32 4294967295, %s474_s15   ;;  %s314_s17 = sadd.s32 4294967294, %s474_s15   ;;  %s474_s15 = sphi %s504_s15, %s687_s15   ;;  %s470_s14 = sphi %s502_s14, %s686_s14   ;;  %s466_s13 = sphi %s500_s13, %s685_s13   ;;  %s462_s12 = sphi %s498_s12, %s684_s12  }
   0x6   : > { %s523_s18 = sadd.s32 1, %s474_s15   ;;  %s26_s19 = sadd.s32 1, %s470_s14 }
   0x7   : > { %s23_s20 = ssub.s32 %s474_s15, %s523_s18  ;;  %p33_p0 = scmp.ne.s32.totalorder %s470_s14, %s466_s13 }
   0x8   : > { %p24_p1 = scmp.eq.s32.totalorder %s23_s20, 0  ;;  %p34_p2 = scmp.eq.s32.totalorder %s474_s15, 0 }
   0x9   : > { %p39_p3 = scmp.ne.s32.totalorder %s466_s13, %s462_s12  ;;  %p40_p4 = scmp.eq.s32.totalorder %s519_s16, 0 }
   0xa   : > { %s535_s21 = scalar_select %p24_p1, %s470_s14, %s26_s19  }
   0xb   : > { %p537_p5 = por %p34_p2, %p33_p0  ;;  %p541_p6 = por %p40_p4, %p39_p3 }
   0xc   : > { %p105_p7 = scmp.eq.s32.totalorder %s519_s16, 1  ;;  %p111_p8 = scmp.eq.s32.totalorder %s314_s17, 1 }
   0xd   : > { %p340_p10 = scmp.lt.s32.totalorder %s474_s15, 2  ;;  %s137_s26 = sand.u32 1, %s470_s14  }
   0xe   : > { %p548_p11 = por %p105_p7, %p33_p0  ;;  %p552_p12 = por %p111_p8, %p39_p3 }
   0xf   : > { %s318_s27 = sshll.u32 %s474_s15, 7  ;;  %s317_s28 = sshll.u32 %s137_s26, 3 }
  0x10   : > { %s676_s24 = scalar_select %p548_p11, 1, 0 }
  0x11   : > { %s677_s25 = scalar_select %p552_p12, 1, 0 }
  0x12   : > { %s561_s4 = scalar_lea.hbm %s669_s0, %s318_s27  ;;  %s141_s5 = scalar_lea.vmem [#allocation2], %s317_s28 }
  0x13   : > { %s148_s6 = sshll.u32 %s141_s5, 4  ;;  %p565_p13 = pnand %p340_p10, %p537_p5  ;;  %s569_s6 = int_to_ptr.vmem [resolvable:$true] %s148_s6 }
  0x14   : > { %s138_s8 = scalar_lea.sflag [#allocation3], %s137_s26  ;;  %s378_s9 = scalar_lea.hbm %s561_s4, 128 }
  0x15   : > { %p379_p2 = scmp.ne.s32.totalorder %s561_s4, %s378_s9  ;;  %p380_p3 = pneg %p565_p13 }
  0x16   : > { %s383_s17 = scalar_lea.hbm %s669_s0, 256  ;;  %p384_p5 = scmp.lt.u32.totalorder %s561_s4, %s669_s0 }
  0x17   : > { %p381_p4 = pnand %p380_p3, %p379_p2  ;;  %p385_p8 = scmp.lt.u32.totalorder %s383_s17, %s378_s9 }
  0x18   : > { %p387_p9 = scmp.lt.u32.totalorder %s378_s9, %s561_s4 }
  0x19   : > { %p382_p7 = pneg %p381_p4  ;;  %p386_p10 = por %p385_p8, %p384_p5 }
  0x1b   : > { %p388_p0 = por %p387_p9, %p386_p10 }
  0x1d   : > { %p389_p1 = pnand %p388_p0, %p382_p7 }
  0x1f   : > { %392 = shalt.err (!%p389_p1)
}
  0x20   : > { %s393_s22 = scalar_lea.vmem %s569_s6, 128  ;;  %s476_s26 = smov [#allocation2]  }
  0x21   : > { %p394_p2 = scmp.ne.s32.totalorder %s569_s6, %s393_s22  ;;  %s398_s27 = sshll.u32 %s476_s26, 4  ;;  %s399_s27 = int_to_ptr.vmem [resolvable:$false] %s398_s27 }
  0x22   : > { %s400_s28 = scalar_lea.vmem %s399_s27, 256  ;;  %p401_p11 = scmp.lt.s32.totalorder %s569_s6, %s399_s27 }
  0x23   : > { %p396_p4 = pnand %p394_p2, %p380_p3  ;;  %p402_p5 = scmp.lt.s32.totalorder %s400_s28, %s393_s22 }
  0x25   : > { %p397_p12 = pneg %p396_p4  ;;  %p403_p8 = por %p402_p5, %p401_p11 }
  0x27   : > { %p404_p9 = pnand %p403_p8, %p397_p12 }
  0x29   : > { %407 = shalt.err (!%p404_p9)
}
  0x2a   : > { %335 = dma.hbm_to_vmem [thread:$0]  (!%p565_p13), %s561_s4, 128, %s569_s6, %s138_s8  }
  0x2b   : > { %p679_p0 = scmp.lt.s32.totalorder %s474_s15, 3  ;;  %p680_p1 = scmp.ge.s32.totalorder %s474_s15, 1 }
  0x2d   : > { %p154_p3 = pnand %p680_p1, %p679_p0 }
  0x2e   : > { %s603_s29 = sand.u32 (!%p154_p3), 1, %s466_s13  }
  0x2f   : > { %157 = sbr.rel (%p154_p3) target bundleno = 397 (0x18d), region = 32  ;;  %s320_s30 = sshll.u32 (!%p154_p3), %s603_s29, 3 }
  0x30   : > { %s160_s5 = scalar_lea.sflag (!%p154_p3), [#allocation3], %s603_s29  ;;  %s163_s7 = scalar_lea.vmem (!%p154_p3), [#allocation2], %s320_s30 }
  0x36   : > { %453 = dma.done.wait (%p541_p6), %s160_s5, 128  }
  0x37   : > { %455 = vsyncadd (%p541_p6), %s160_s5, 4294967168  ;;  %v186_v0 = vld [vmem:[%s163_s7] sm:$0xff]  ;;  %v187_v1 = vlaneseq  ;;  %s325_s9 = sshll.u32 %s519_s16, 7  ;;  %s185_s10 = scalar_lea.vmem [#allocation5], %s320_s30 }
  0x38   : > { %190 = vadd.xlane.f32.xlu0 %v186_v0  ;;  %v322_v17 = vld [vmem:[%s670_s1] ss:$0 sm:$0xff]  ;;  %s244_s11 = sshll.u32 %s185_s10, 4  ;;  %s625_s20 = scalar_lea.hbm %s672_s3, %s325_s9  ;;  %s627_s11 = int_to_ptr.vmem [resolvable:$true] %s244_s11 }
  0x39   : > { %v188_v3 = vand.u32 127, %v187_v1  ;;  %v323_v19 = vld [vmem:[%s671_s2] ss:$0 sm:$0xff]  ;;  %s231_s22 = scalar_lea.sflag [#allocation4], %s603_s29  ;;  %s408_s26 = scalar_lea.vmem %s627_s11, 128 }
  0x3a   : > { %p409_p6 = scmp.ne.s32.totalorder %s627_s11, %s408_s26  ;;  %p681_p11 = scmp.ne.s32.totalorder %s676_s24, 0 }
  0x3b   : > { %vm189_vm0 = vcmp.lt.s32.totalorder %v188_v3, 32  ;;  %s477_s16 = smov [#allocation5]  }
  0x3c   : > { %p410_p12 = pnand %p409_p6, %p681_p11  ;;  %s412_s27 = sshll.u32 %s477_s16, 4  ;;  %s413_s27 = int_to_ptr.vmem [resolvable:$false] %s412_s27 }
  0x3d   : > { %s414_s28 = scalar_lea.vmem %s413_s27, 256  ;;  %p415_p7 = scmp.lt.s32.totalorder %s627_s11, %s413_s27 }
  0x3e   : > { %p411_p13 = pneg %p410_p12  ;;  %p416_p10 = scmp.lt.s32.totalorder %s414_s28, %s408_s26 }
  0x40   : > { %p417_p2 = por %p416_p10, %p415_p7 }
  0x42   : > { %p418_p4 = pnand %p417_p2, %p411_p13 }
  0xc5   : > { %v191_v2 = vpop.xlane.xlu0 %190 }
  0xc6   : > { %v193_v4 = vmul.f32 0.03125, %v191_v2 }
  0xc8   : > { %v194_v5 = vsub.f32 %v186_v0, %v193_v4 }
  0xca   : > { %v195_v6 = vmul.f32 %v194_v5, %v194_v5 }
  0xcc   : > { %v198_v7 = vsel %vm189_vm0, %v195_v6, 0.0 }
  0xcd   : > { %199 = vadd.xlane.f32.xlu0 %v198_v7 }
 0x15a   : > { %v200_v8 = vpop.xlane.xlu0 %199 }
 0x15b   : > { %v202_v9 = vmul.f32 0.032258064, %v200_v8 }
 0x15d   : > { %374 = vrsqrt.f32 %v202_v9  ;;  %vm205_vm1 = vcmp.eq.f32.partialorder %v202_v9, inf  ;;  %v208_v12 = vand.u32 2147483648, %v202_v9  ;;  %vm207_vm2 = vcmp.eq.f32.partialorder %v202_v9, 0.0 }
 0x167   : > { %v375_v10 = vpop.eup %374 }
 0x168   : > { %v204_v11 = vmul.f32 %v375_v10, %v202_v9 }
 0x16a   : > { %v206_v13 = vsel %vm205_vm1, %v202_v9, %v204_v11 }
 0x16b   : > { %v209_v14 = vsel %vm207_vm2, %v208_v12, %v206_v13 }
 0x16c   : > { %v210_v15 = vadd.f32 1e-06, %v209_v14 }
 0x16e   : > { %376 = vrcp.f32 %v210_v15 }
 0x178   : > { %v377_v16 = vpop.eup %376 }
 0x179   : > { %v212_v18 = vmul.f32 %v377_v16, %v194_v5 }
 0x17b   : > { %v220_v20 = vmul.f32 %v322_v17, %v212_v18 }
 0x17d   : > { %v228_v21 = vadd.f32 %v323_v19, %v220_v20 }
 0x17f   : > { %229 = vst [vmem:[%s185_s10] sm:$0xff] %v228_v21 }
 0x180   : > { %421 = shalt.err (!%p418_p4)
}
 0x181   : > { %s422_s29 = scalar_lea.hbm %s625_s20, 128  ;;  %s426_s7 = scalar_lea.hbm %s672_s3, 256 }
 0x182   : > { %p423_p5 = scmp.ne.s32.totalorder %s625_s20, %s422_s29  ;;  %p427_p0 = scmp.lt.u32.totalorder %s625_s20, %s672_s3 }
 0x183   : > { %p428_p1 = scmp.lt.u32.totalorder %s426_s7, %s422_s29  ;;  %p430_p6 = scmp.lt.u32.totalorder %s422_s29, %s625_s20 }
 0x184   : > { %p424_p8 = pnand %p423_p5, %p681_p11 }
 0x185   : > { %p429_p3 = por %p428_p1, %p427_p0 }
 0x186   : > { %p425_p9 = pneg %p424_p8 }
 0x187   : > { %p431_p12 = por %p430_p6, %p429_p3 }
 0x189   : > { %p432_p13 = pnand %p431_p12, %p425_p9 }
 0x18b   : > { %435 = shalt.err (!%p432_p13)
}
 0x18c   : > { %330 = dma.vmem_to_hbm [thread:$0]  (%p681_p11), %s627_s11, 128, %s625_s20, %s231_s22  }
 0x18d PF: > { %s256_s6 = sand.u32 1, %s462_s12   ;;  %p682_p7 = scmp.ne.s32.totalorder %s677_s25, 0 }
 0x18e   : > { %p683_p10 = scmp.ge.s32.totalorder %s474_s15, 2  ;;  %s257_s8 = scalar_lea.sflag [#allocation4], %s256_s6 }
 0x190   : > { %p337_p2 = pnand %p683_p10, %p682_p7 }
 0x192   : > { %457 = dma.done.wait (!%p337_p2), %s257_s8, 128  }
 0x193   : > { %459 = vsyncadd (!%p337_p2), %s257_s8, 4294967168  ;;  %p16_p4 = scmp.ge.s32.totalorder %s523_s18, 4   ;;  %s684_s12 = smov %s466_s13 }
 0x194   : > { %s685_s13 = smov %s470_s14  ;;  %s686_s14 = smov %s535_s21 }
 0x195   : > { %s687_s15 = smov %s523_s18  ;;  %18 = sbr.rel (!%p16_p4) target bundleno = 5 (0x5), region = 77 }
 0x19c   :  { %262 = vsyncpa [#allocation3], 1 }
 0x19d   :  { %264 = vsyncpa [#allocation3 + $0x1], 1 }
 0x19e   :  { %265 = vsyncpa [#allocation4], 1 }
 0x19f   :  { %267 = vsyncpa [#allocation4 + $0x1], 1 }

</bundles_post_ra>
